<compile_context>
chip_gen: v7x
topology: tpu7x:2x2x1
jax: 0.10.0
libtpu: 0.0.40
codegen_flags: <defaults>
</compile_context>

<pallas_src>
import numpy as np
import jax
import jax.numpy as jnp
from jax.experimental import pallas as pl
from jax.experimental.pallas import tpu as pltpu

LANE = 128
SUBLANE_BF16 = 16          # bf16 packs 16 sublanes per vreg -> round batch tiles to 16
MAX_TILE_B = 2048          # rows per grid step; VMEM usage stays at a few MiB
MIN_PARALLEL_B = 256       # force >= 2 grid steps above this so v7x uses both TCs


def _round_up(x, m):
    return ((x + m - 1) // m) * m


def actor_v2_kernel(x_ref,
                    w1_ref, b1_ref, w2_ref, b2_ref, w3_ref, b3_ref,
                    w4_ref, b4_ref, w5_ref, b5_ref, w6_ref, b6_ref,
                    out_ref):
    def layer(h_bf16, w_ref, b_ref):
        # bf16 x bf16 matmul on the MXU, f32 accumulate, f32 bias add.
        return jnp.dot(h_bf16, w_ref[...],
                       preferred_element_type=jnp.float32) + b_ref[...]

    h = x_ref[...]                                                          # bf16 obs tile
    h = jnp.maximum(layer(h, w1_ref, b1_ref), 0.0).astype(jnp.bfloat16)     # fc1 + relu
    h = jnp.maximum(layer(h, w2_ref, b2_ref), 0.0).astype(jnp.bfloat16)     # fc2 + relu
    h = jnp.maximum(layer(h, w3_ref, b3_ref), 0.0).astype(jnp.bfloat16)     # fc3 + relu
    h = jnp.maximum(layer(h, w4_ref, b4_ref), 0.0).astype(jnp.bfloat16)     # fc4 + relu
    h = jnp.maximum(layer(h, w5_ref, b5_ref), 0.0).astype(jnp.bfloat16)     # fc5 + relu
    out_ref[...] = jnp.tanh(layer(h, w6_ref, b6_ref)).astype(jnp.bfloat16)  # fc6 + tanh


def _actor_v2_forward_impl(observation, params):
    """observation: [B, obs_dim] f32; params: list of (W [in,out], b [1,out]) f32."""
    B, obs_dim = observation.shape
    action_dim = params[-1][0].shape[1]

    # ---- lane-pad every hidden/output width (and matching K rows) to 128 ----
    dims = [obs_dim] + [w.shape[1] for w, _ in params]
    pdims = [obs_dim] + [_round_up(d, LANE) for d in dims[1:]]
    padded_params = []
    for li, (w, b) in enumerate(params):
        d_in, d_out = dims[li], dims[li + 1]
        p_in, p_out = pdims[li], pdims[li + 1]
        wp = jnp.pad(w, ((0, p_in - d_in), (0, p_out - d_out)))
        bp = jnp.pad(b, ((0, 0), (0, p_out - d_out)))
        padded_params.append((wp, bp))
    out_pad = pdims[-1]

    # ---- balanced batch tiling (+ forced 2-way split for v7x megacore) ----
    n_tiles = max(1, -(-B // MAX_TILE_B))
    if B >= MIN_PARALLEL_B:
        n_tiles = max(n_tiles, 2)
    tile_b = _round_up(-(-B // n_tiles), SUBLANE_BF16)
    b_pad = tile_b * n_tiles

    obs = observation.astype(jnp.bfloat16)
    if b_pad != B:
        obs = jnp.pad(obs, ((0, b_pad - B), (0, 0)))

    flat_args = [obs]
    in_specs = [pl.BlockSpec((tile_b, obs_dim), lambda i: (i, 0))]
    for w, b in padded_params:
        flat_args.append(w.astype(jnp.bfloat16))   # halve weight DMA, 2x MXU rate
        flat_args.append(b.astype(jnp.float32))
        # Constant index_map: weights/biases stay resident in VMEM across the grid.
        in_specs.append(pl.BlockSpec(w.shape, lambda i: (0, 0)))
        in_specs.append(pl.BlockSpec(b.shape, lambda i: (0, 0)))

    flops = 2 * b_pad * sum(di * do for di, do in zip(pdims[:-1], pdims[1:]))
    weight_bytes = sum(w.size * 2 + b.size * 4 for w, b in padded_params)
    bytes_accessed = weight_bytes + b_pad * obs_dim * 2 + b_pad * out_pad * 2
    cost = pl.CostEstimate(flops=flops,
                           transcendentals=b_pad * action_dim,
                           bytes_accessed=bytes_accessed)

    out = pl.pallas_call(
        actor_v2_kernel,
        grid=(n_tiles,),
        out_shape=jax.ShapeDtypeStruct((b_pad, out_pad), jnp.bfloat16),
        in_specs=in_specs,
        out_specs=pl.BlockSpec((tile_b, out_pad), lambda i: (i, 0)),
        compiler_params=pltpu.CompilerParams(
            dimension_semantics=("parallel",),        # shard batch grid over v7x's 2 TCs
            vmem_limit_bytes=32 * 1024 * 1024,        # safe on v5e/v6e/v7x; usage is a few MiB
        ),
        cost_estimate=cost,
    )(*flat_args)

    return out[:B, :action_dim].astype(jnp.float32)


actor_v2_forward = jax.jit(_actor_v2_forward_impl)


def init_params(key, obs_dim, action_dim,
                fc1_units=512, fc2_units=256, fc3_units=128,
                fc4_units=64, fc5_units=32):
    """Synthetic init mirroring Actor_v2.reset_parameters.

    hidden_init uses weight.size()[0] == out_features, so the weight limit for
    hidden layers is 1/sqrt(out_features); fc6 uses +/-0.003. Biases keep the
    default nn.Linear init U(-1/sqrt(in_features), +1/sqrt(in_features)).
    Weights are stored as [in, out] (transposed vs. PyTorch's [out, in]).
    """
    dims = [obs_dim, fc1_units, fc2_units, fc3_units, fc4_units, fc5_units, action_dim]
    params = []
    for li in range(6):
        d_in, d_out = dims[li], dims[li + 1]
        key, kw, kb = jax.random.split(key, 3)
        w_lim = (1.0 / np.sqrt(d_out)) if li < 5 else 0.003
        b_lim = 1.0 / np.sqrt(d_in)
        w = jax.random.uniform(kw, (d_in, d_out), jnp.float32, -w_lim, w_lim)
        b = jax.random.uniform(kb, (1, d_out), jnp.float32, -b_lim, b_lim)
        params.append((w, b))
    return params


def reference_forward(observation, params, cast_bf16=False):
    """Pure-JAX reference. cast_bf16=True mirrors the kernel's bf16 matmul path."""
    h = observation.astype(jnp.float32)
    for i, (w, b) in enumerate(params):
        if cast_bf16:
            y = jnp.dot(h.astype(jnp.bfloat16), w.astype(jnp.bfloat16),
                        preferred_element_type=jnp.float32) + b
        else:
            y = jnp.dot(h, w, preferred_element_type=jnp.float32) + b
        h = jnp.tanh(y) if i == 5 else jnp.maximum(y, 0.0)
    return h


if __name__ == "__main__":
    key = jax.random.PRNGKey(0)

    batch = 4
    obs_dim = 16
    action_dim = 8

    key, k_obs, k_params, k_big = jax.random.split(key, 4)
    observation = jax.random.normal(k_obs, (batch, obs_dim), jnp.float32)
    params = init_params(k_params, obs_dim, action_dim)

    # --- small batch (single tile, grid=1) ---
    out = jax.block_until_ready(actor_v2_forward(observation, params))
    assert out.shape == (batch, action_dim)
    # Check against a reference that mirrors the bf16 matmul path (kernel output is bf16).
    ref_bf16 = reference_forward(observation, params, cast_bf16=True)
    np.testing.assert_allclose(np.asarray(out), np.asarray(ref_bf16),
                               rtol=1e-2, atol=1e-2)
    # Semantics check against the full-f32 module forward (bf16 quantization only).
    ref_f32 = reference_forward(observation, params, cast_bf16=False)
    np.testing.assert_allclose(np.asarray(out), np.asarray(ref_f32), atol=3e-2)

    # --- larger batch exercising the balanced 2-step parallel grid ---
    big_batch = 600
    big_obs = jax.random.normal(k_big, (big_batch, obs_dim), jnp.float32)
    big_out = jax.block_until_ready(actor_v2_forward(big_obs, params))
    assert big_out.shape == (big_batch, action_dim)
    big_ref = reference_forward(big_obs, params, cast_bf16=True)
    np.testing.assert_allclose(np.asarray(big_out), np.asarray(big_ref),
                               rtol=1e-2, atol=1e-2)

    print("KERNEL_OK")
</pallas_src>

<mosaic_0001>
module attributes {stable_mosaic.version = 11 : i64} {
  func.func @actor_v2_kernel(%arg0: i32, %arg1: memref<16x16xbf16, #tpu.memory_space<vmem>>, %arg2: memref<16x512xbf16, #tpu.memory_space<vmem>>, %arg3: memref<1x512xf32, #tpu.memory_space<vmem>>, %arg4: memref<512x256xbf16, #tpu.memory_space<vmem>>, %arg5: memref<1x256xf32, #tpu.memory_space<vmem>>, %arg6: memref<256x128xbf16, #tpu.memory_space<vmem>>, %arg7: memref<1x128xf32, #tpu.memory_space<vmem>>, %arg8: memref<128x128xbf16, #tpu.memory_space<vmem>>, %arg9: memref<1x128xf32, #tpu.memory_space<vmem>>, %arg10: memref<128x128xbf16, #tpu.memory_space<vmem>>, %arg11: memref<1x128xf32, #tpu.memory_space<vmem>>, %arg12: memref<128x128xbf16, #tpu.memory_space<vmem>>, %arg13: memref<1x128xf32, #tpu.memory_space<vmem>>, %arg14: memref<16x128xbf16, #tpu.memory_space<vmem>>) attributes {dimension_semantics = [#tpu.dimension_semantics<parallel>], iteration_bounds = array<i64: 1>, scalar_prefetch = 0 : i64, scratch_operands = 0 : i64, tpu.core_type = #tpu.core_type<tc>, window_params = [{transform_indices = @transform_0, window_bounds = array<i64: 16, 16>}, {pipeline_mode = #tpu.pipeline_mode<synchronous>, transform_indices = @transform_1, window_bounds = array<i64: 16, 512>}, {pipeline_mode = #tpu.pipeline_mode<synchronous>, transform_indices = @transform_2, window_bounds = array<i64: 1, 512>}, {pipeline_mode = #tpu.pipeline_mode<synchronous>, transform_indices = @transform_3, window_bounds = array<i64: 512, 256>}, {pipeline_mode = #tpu.pipeline_mode<synchronous>, transform_indices = @transform_4, window_bounds = array<i64: 1, 256>}, {pipeline_mode = #tpu.pipeline_mode<synchronous>, transform_indices = @transform_5, window_bounds = array<i64: 256, 128>}, {pipeline_mode = #tpu.pipeline_mode<synchronous>, transform_indices = @transform_6, window_bounds = array<i64: 1, 128>}, {pipeline_mode = #tpu.pipeline_mode<synchronous>, transform_indices = @transform_7, window_bounds = array<i64: 128, 128>}, {pipeline_mode = #tpu.pipeline_mode<synchronous>, transform_indices = @transform_8, window_bounds = array<i64: 1, 128>}, {pipeline_mode = #tpu.pipeline_mode<synchronous>, transform_indices = @transform_9, window_bounds = array<i64: 128, 128>}, {pipeline_mode = #tpu.pipeline_mode<synchronous>, transform_indices = @transform_10, window_bounds = array<i64: 1, 128>}, {pipeline_mode = #tpu.pipeline_mode<synchronous>, transform_indices = @transform_11, window_bounds = array<i64: 128, 128>}, {pipeline_mode = #tpu.pipeline_mode<synchronous>, transform_indices = @transform_12, window_bounds = array<i64: 1, 128>}, {transform_indices = @transform_13, window_bounds = array<i64: 16, 128>}]} {
    %c0 = arith.constant 0 : index
    %c0_0 = arith.constant 0 : index
    %0 = vector.load %arg1[%c0, %c0_0] : memref<16x16xbf16, #tpu.memory_space<vmem>>, vector<16x16xbf16>
    %c0_1 = arith.constant 0 : index
    %c0_2 = arith.constant 0 : index
    %1 = vector.load %arg2[%c0_1, %c0_2] : memref<16x512xbf16, #tpu.memory_space<vmem>>, vector<16x512xbf16>
    %cst = arith.constant dense<0.000000e+00> : vector<16x512xf32>
    %2 = tpu.matmul %0, %1, %cst {dimension_numbers = #tpu.dot_dimension_numbers<[1], [0], [0], [1], [0, 0, 1, 1], [], []>} : vector<16x16xbf16>, vector<16x512xbf16>, vector<16x512xf32> -> vector<16x512xf32>
    %c0_3 = arith.constant 0 : index
    %c0_4 = arith.constant 0 : index
    %3 = vector.load %arg3[%c0_3, %c0_4] : memref<1x512xf32, #tpu.memory_space<vmem>>, vector<1x512xf32>
    %4 = vector.broadcast %3 : vector<1x512xf32> to vector<16x512xf32>
    %5 = arith.addf %2, %4 : vector<16x512xf32>
    %cst_5 = arith.constant 0.000000e+00 : f32
    %6 = vector.broadcast %cst_5 : f32 to vector<16x512xf32>
    %7 = arith.maximumf %5, %6 : vector<16x512xf32>
    %8 = arith.truncf %7 : vector<16x512xf32> to vector<16x512xbf16>
    %c0_6 = arith.constant 0 : index
    %c0_7 = arith.constant 0 : index
    %9 = vector.load %arg4[%c0_6, %c0_7] : memref<512x256xbf16, #tpu.memory_space<vmem>>, vector<512x256xbf16>
    %cst_8 = arith.constant dense<0.000000e+00> : vector<16x256xf32>
    %10 = tpu.matmul %8, %9, %cst_8 {dimension_numbers = #tpu.dot_dimension_numbers<[1], [0], [0], [1], [0, 0, 1, 1], [], []>} : vector<16x512xbf16>, vector<512x256xbf16>, vector<16x256xf32> -> vector<16x256xf32>
    %c0_9 = arith.constant 0 : index
    %c0_10 = arith.constant 0 : index
    %11 = vector.load %arg5[%c0_9, %c0_10] : memref<1x256xf32, #tpu.memory_space<vmem>>, vector<1x256xf32>
    %12 = vector.broadcast %11 : vector<1x256xf32> to vector<16x256xf32>
    %13 = arith.addf %10, %12 : vector<16x256xf32>
    %cst_11 = arith.constant 0.000000e+00 : f32
    %14 = vector.broadcast %cst_11 : f32 to vector<16x256xf32>
    %15 = arith.maximumf %13, %14 : vector<16x256xf32>
    %16 = arith.truncf %15 : vector<16x256xf32> to vector<16x256xbf16>
    %c0_12 = arith.constant 0 : index
    %c0_13 = arith.constant 0 : index
    %17 = vector.load %arg6[%c0_12, %c0_13] : memref<256x128xbf16, #tpu.memory_space<vmem>>, vector<256x128xbf16>
    %cst_14 = arith.constant dense<0.000000e+00> : vector<16x128xf32>
    %18 = tpu.matmul %16, %17, %cst_14 {dimension_numbers = #tpu.dot_dimension_numbers<[1], [0], [0], [1], [0, 0, 1, 1], [], []>} : vector<16x256xbf16>, vector<256x128xbf16>, vector<16x128xf32> -> vector<16x128xf32>
    %c0_15 = arith.constant 0 : index
    %c0_16 = arith.constant 0 : index
    %19 = vector.load %arg7[%c0_15, %c0_16] : memref<1x128xf32, #tpu.memory_space<vmem>>, vector<1x128xf32>
    %20 = vector.broadcast %19 : vector<1x128xf32> to vector<16x128xf32>
    %21 = arith.addf %18, %20 : vector<16x128xf32>
    %cst_17 = arith.constant 0.000000e+00 : f32
    %22 = vector.broadcast %cst_17 : f32 to vector<16x128xf32>
    %23 = arith.maximumf %21, %22 : vector<16x128xf32>
    %24 = arith.truncf %23 : vector<16x128xf32> to vector<16x128xbf16>
    %c0_18 = arith.constant 0 : index
    %c0_19 = arith.constant 0 : index
    %25 = vector.load %arg8[%c0_18, %c0_19] : memref<128x128xbf16, #tpu.memory_space<vmem>>, vector<128x128xbf16>
    %cst_20 = arith.constant dense<0.000000e+00> : vector<16x128xf32>
    %26 = tpu.matmul %24, %25, %cst_20 {dimension_numbers = #tpu.dot_dimension_numbers<[1], [0], [0], [1], [0, 0, 1, 1], [], []>} : vector<16x128xbf16>, vector<128x128xbf16>, vector<16x128xf32> -> vector<16x128xf32>
    %c0_21 = arith.constant 0 : index
    %c0_22 = arith.constant 0 : index
    %27 = vector.load %arg9[%c0_21, %c0_22] : memref<1x128xf32, #tpu.memory_space<vmem>>, vector<1x128xf32>
    %28 = vector.broadcast %27 : vector<1x128xf32> to vector<16x128xf32>
    %29 = arith.addf %26, %28 : vector<16x128xf32>
    %cst_23 = arith.constant 0.000000e+00 : f32
    %30 = vector.broadcast %cst_23 : f32 to vector<16x128xf32>
    %31 = arith.maximumf %29, %30 : vector<16x128xf32>
    %32 = arith.truncf %31 : vector<16x128xf32> to vector<16x128xbf16>
    %c0_24 = arith.constant 0 : index
    %c0_25 = arith.constant 0 : index
    %33 = vector.load %arg10[%c0_24, %c0_25] : memref<128x128xbf16, #tpu.memory_space<vmem>>, vector<128x128xbf16>
    %cst_26 = arith.constant dense<0.000000e+00> : vector<16x128xf32>
    %34 = tpu.matmul %32, %33, %cst_26 {dimension_numbers = #tpu.dot_dimension_numbers<[1], [0], [0], [1], [0, 0, 1, 1], [], []>} : vector<16x128xbf16>, vector<128x128xbf16>, vector<16x128xf32> -> vector<16x128xf32>
    %c0_27 = arith.constant 0 : index
    %c0_28 = arith.constant 0 : index
    %35 = vector.load %arg11[%c0_27, %c0_28] : memref<1x128xf32, #tpu.memory_space<vmem>>, vector<1x128xf32>
    %36 = vector.broadcast %35 : vector<1x128xf32> to vector<16x128xf32>
    %37 = arith.addf %34, %36 : vector<16x128xf32>
    %cst_29 = arith.constant 0.000000e+00 : f32
    %38 = vector.broadcast %cst_29 : f32 to vector<16x128xf32>
    %39 = arith.maximumf %37, %38 : vector<16x128xf32>
    %40 = arith.truncf %39 : vector<16x128xf32> to vector<16x128xbf16>
    %c0_30 = arith.constant 0 : index
    %c0_31 = arith.constant 0 : index
    %41 = vector.load %arg12[%c0_30, %c0_31] : memref<128x128xbf16, #tpu.memory_space<vmem>>, vector<128x128xbf16>
    %cst_32 = arith.constant dense<0.000000e+00> : vector<16x128xf32>
    %42 = tpu.matmul %40, %41, %cst_32 {dimension_numbers = #tpu.dot_dimension_numbers<[1], [0], [0], [1], [0, 0, 1, 1], [], []>} : vector<16x128xbf16>, vector<128x128xbf16>, vector<16x128xf32> -> vector<16x128xf32>
    %c0_33 = arith.constant 0 : index
    %c0_34 = arith.constant 0 : index
    %43 = vector.load %arg13[%c0_33, %c0_34] : memref<1x128xf32, #tpu.memory_space<vmem>>, vector<1x128xf32>
    %44 = vector.broadcast %43 : vector<1x128xf32> to vector<16x128xf32>
    %45 = arith.addf %42, %44 : vector<16x128xf32>
    %46 = math.tanh %45 : vector<16x128xf32>
    %47 = arith.truncf %46 : vector<16x128xf32> to vector<16x128xbf16>
    %c0_35 = arith.constant 0 : index
    %c0_36 = arith.constant 0 : index
    %48 = vector.load %arg14[%c0_35, %c0_36] : memref<16x128xbf16, #tpu.memory_space<vmem>>, vector<16x128xbf16>
    tpu.vector_store %arg14[%c0_35, %c0_36], %47 {strides = array<i32>} : memref<16x128xbf16, #tpu.memory_space<vmem>>, vector<16x128xbf16>,
    return
  }
  func.func @transform_0(%arg0: i32) -> (i32, i32) {
    %c0_i32 = arith.constant 0 : i32
    %c0_i32_0 = arith.constant 0 : i32
    return %arg0, %c0_i32 : i32, i32
  }
  func.func @transform_1(%arg0: i32) -> (i32, i32) {
    %c0_i32 = arith.constant 0 : i32
    %c0_i32_0 = arith.constant 0 : i32
    %c0_i32_1 = arith.constant 0 : i32
    return %c0_i32, %c0_i32_0 : i32, i32
  }
  func.func @transform_2(%arg0: i32) -> (i32, i32) {
    %c0_i32 = arith.constant 0 : i32
    %c0_i32_0 = arith.constant 0 : i32
    %c0_i32_1 = arith.constant 0 : i32
    return %c0_i32, %c0_i32_0 : i32, i32
  }
  func.func @transform_3(%arg0: i32) -> (i32, i32) {
    %c0_i32 = arith.constant 0 : i32
    %c0_i32_0 = arith.constant 0 : i32
    %c0_i32_1 = arith.constant 0 : i32
    return %c0_i32, %c0_i32_0 : i32, i32
  }
  func.func @transform_4(%arg0: i32) -> (i32, i32) {
    %c0_i32 = arith.constant 0 : i32
    %c0_i32_0 = arith.constant 0 : i32
    %c0_i32_1 = arith.constant 0 : i32
    return %c0_i32, %c0_i32_0 : i32, i32
  }
  func.func @transform_5(%arg0: i32) -> (i32, i32) {
    %c0_i32 = arith.constant 0 : i32
    %c0_i32_0 = arith.constant 0 : i32
    %c0_i32_1 = arith.constant 0 : i32
    return %c0_i32, %c0_i32_0 : i32, i32
  }
  func.func @transform_6(%arg0: i32) -> (i32, i32) {
    %c0_i32 = arith.constant 0 : i32
    %c0_i32_0 = arith.constant 0 : i32
    %c0_i32_1 = arith.constant 0 : i32
    return %c0_i32, %c0_i32_0 : i32, i32
  }
  func.func @transform_7(%arg0: i32) -> (i32, i32) {
    %c0_i32 = arith.constant 0 : i32
    %c0_i32_0 = arith.constant 0 : i32
    %c0_i32_1 = arith.constant 0 : i32
    return %c0_i32, %c0_i32_0 : i32, i32
  }
  func.func @transform_8(%arg0: i32) -> (i32, i32) {
    %c0_i32 = arith.constant 0 : i32
    %c0_i32_0 = arith.constant 0 : i32
    %c0_i32_1 = arith.constant 0 : i32
    return %c0_i32, %c0_i32_0 : i32, i32
  }
  func.func @transform_9(%arg0: i32) -> (i32, i32) {
    %c0_i32 = arith.constant 0 : i32
    %c0_i32_0 = arith.constant 0 : i32
    %c0_i32_1 = arith.constant 0 : i32
    return %c0_i32, %c0_i32_0 : i32, i32
  }
  func.func @transform_10(%arg0: i32) -> (i32, i32) {
    %c0_i32 = arith.constant 0 : i32
    %c0_i32_0 = arith.constant 0 : i32
    %c0_i32_1 = arith.constant 0 : i32
    return %c0_i32, %c0_i32_0 : i32, i32
  }
  func.func @transform_11(%arg0: i32) -> (i32, i32) {
    %c0_i32 = arith.constant 0 : i32
    %c0_i32_0 = arith.constant 0 : i32
    %c0_i32_1 = arith.constant 0 : i32
    return %c0_i32, %c0_i32_0 : i32, i32
  }
  func.func @transform_12(%arg0: i32) -> (i32, i32) {
    %c0_i32 = arith.constant 0 : i32
    %c0_i32_0 = arith.constant 0 : i32
    %c0_i32_1 = arith.constant 0 : i32
    return %c0_i32, %c0_i32_0 : i32, i32
  }
  func.func @transform_13(%arg0: i32) -> (i32, i32) {
    %c0_i32 = arith.constant 0 : i32
    %c0_i32_0 = arith.constant 0 : i32
    return %arg0, %c0_i32 : i32, i32
  }
}

</mosaic_0001>

<bundles_post_ra>
// kernel: _actor_v2_forward_impl.1
= control target key start
LH: loop header
LB: loop body
LE: loop exit
PB: predicated region body
PF: predicated region fallthrough
CT: control target
= control target key end

     0   :  { %v1616_v1 = vmov 0   ;;  %vm98_vm0 = vcmask 130048   ;;  %v53_v50 = vlaneseq  ;;  %vm1618_vm1 = vmmov 0   ;;  %s2084_s1 = inlined_call_operand.vmem [shape: bf16[16,512], index: 1, kind: input, shape index: {}]   ;;  %s2085_s0 = inlined_call_operand.vmem [shape: bf16[16,16], index: 0, kind: input, shape index: {}]   ;;  %s2086_s3 = inlined_call_operand.vmem [shape: bf16[512,256], index: 3, kind: input, shape index: {}]   ;;  %s2087_s5 = inlined_call_operand.vmem [shape: bf16[256,128], index: 5, kind: input, shape index: {}]   ;;  %s2088_s2 = inlined_call_operand.vmem [shape: f32[1,512], index: 2, kind: input, shape index: {}]   ;;  %s2089_s7 = inlined_call_operand.vmem [shape: bf16[128,128], index: 7, kind: input, shape index: {}]   ;;  %s2090_s4 = inlined_call_operand.vmem [shape: f32[1,256], index: 4, kind: input, shape index: {}]   ;;  %s2091_s9 = inlined_call_operand.vmem [shape: bf16[128,128], index: 9, kind: input, shape index: {}]   ;;  %s2092_s6 = inlined_call_operand.vmem [shape: f32[1,128], index: 6, kind: input, shape index: {}]   ;;  %s2093_s11 = inlined_call_operand.vmem [shape: bf16[128,128], index: 11, kind: input, shape index: {}]   ;;  %s2094_s8 = inlined_call_operand.vmem [shape: f32[1,128], index: 8, kind: input, shape index: {}]   ;;  %s2095_s10 = inlined_call_operand.vmem [shape: f32[1,128], index: 10, kind: input, shape index: {}]   ;;  %s2096_s12 = inlined_call_operand.vmem [shape: f32[1,128], index: 12, kind: input, shape index: {}]   ;;  %s2097_s13 = inlined_call_operand.vmem [shape: bf16[16,128], index: 13, kind: output, shape index: {}]  }
   0x1   :  { %v1469_v0 = vld [vmem:[%s2084_s1 + $0x4] ss:$16 sps:$4 sm:$0xff]   ;;  %134 = vmatprep.mubr.bf16.mxu0 %v1616_v1  ;;  %177 = vmatprep.mubr.bf16.mxu1 %v1616_v1  ;;  %v1471_v2 = vld [vmem:[%s2084_s1] ss:$16 sps:$4 sm:$0xff]   ;;  %v1473_v4 = vld [vmem:[%s2084_s1 + $0xc] ss:$16 sps:$4 sm:$0xff]  }
   0x2   :  { %102 = vmatprep.subr.bf16.mxu0 %v1469_v0  ;;  %v1472_v3 = vld [vmem:[%s2085_s0] sm:$0xff]   ;;  %v1475_v5 = vld [vmem:[%s2084_s1 + $0x8] ss:$16 sps:$4 sm:$0xff]   ;;  %145 = vmatprep.subr.bf16.mxu1 %v1473_v4  ;;  %v1481_v8 = vld [vmem:[%s2086_s3 + $0x14] ss:$8 sps:$4 sm:$0xff]   ;;  %v1836_v51 = vshrl.u32 %v53_v50, 7 }
   0x3   :  { %103 = vmatpush1.bf16.msra.mxu0 %v1471_v2  ;;  %v1476_v6 = vld [vmem:[%s2086_s3] ss:$8 sps:$4 sm:$0xff]   ;;  %v1478_v7 = vld [vmem:[%s2086_s3 + $0x4] ss:$8 sps:$4 sm:$0xff]   ;;  %146 = vmatpush1.bf16.msra.mxu1 %v1475_v5  ;;  %v1479_v9 = vld [vmem:[%s2086_s3 + $0x10] ss:$8 sps:$4 sm:$0xff]  }
   0x4   :  { %596 = vmatprep.subr.bf16.mxu0 %v1478_v7  ;;  %v1484_v10 = vld [vmem:[%s2086_s3 + $0x24] ss:$8 sps:$4 sm:$0xff]   ;;  %v1482_v11 = vld [vmem:[%s2086_s3 + $0x20] ss:$8 sps:$4 sm:$0xff]   ;;  %v1487_v12 = vld [vmem:[%s2086_s3 + $0x34] ss:$8 sps:$4 sm:$0xff]  }
   0x5   :  { %v1485_v13 = vld [vmem:[%s2086_s3 + $0x30] ss:$8 sps:$4 sm:$0xff]   ;;  %v1490_v14 = vld [vmem:[%s2086_s3 + $0x44] ss:$8 sps:$4 sm:$0xff]   ;;  %v1488_v15 = vld [vmem:[%s2086_s3 + $0x40] ss:$8 sps:$4 sm:$0xff]  }
   0x6   :  { %1230 = vmatmul.mubr.msk.bf16.vlgmr.msra.gmra.mrb[0].mxu0 %vm98_vm0, %v1472_v3  ;;  %1231 = vmatmul.mubr.msk.bf16.vlgmr.msra.gmra.mrb[0].mxu1 %vm98_vm0, %v1472_v3  ;;  %v1493_v16 = vld [vmem:[%s2086_s3 + $0x54] ss:$8 sps:$4 sm:$0xff]   ;;  %v1491_v17 = vld [vmem:[%s2086_s3 + $0x50] ss:$8 sps:$4 sm:$0xff]   ;;  %v1496_v18 = vld [vmem:[%s2086_s3 + $0x64] ss:$8 sps:$4 sm:$0xff]  }
   0x7   :  { %597 = vmatpush1.bf16.msra.mxu0 %v1476_v6  ;;  %v1494_v19 = vld [vmem:[%s2086_s3 + $0x60] ss:$8 sps:$4 sm:$0xff]   ;;  %v1499_v20 = vld [vmem:[%s2086_s3 + $0x74] ss:$8 sps:$4 sm:$0xff]   ;;  %v1497_v21 = vld [vmem:[%s2086_s3 + $0x70] ss:$8 sps:$4 sm:$0xff]  }
   0x8   :  { %598 = vmatprep.subr.bf16.mxu0 %v1481_v8  ;;  %v1502_v22 = vld [vmem:[%s2086_s3 + $0x84] ss:$8 sps:$4 sm:$0xff]   ;;  %v1500_v23 = vld [vmem:[%s2086_s3 + $0x80] ss:$8 sps:$4 sm:$0xff]   ;;  %v1505_v24 = vld [vmem:[%s2086_s3 + $0x94] ss:$8 sps:$4 sm:$0xff]  }
   0x9   :  { %v1503_v25 = vld [vmem:[%s2086_s3 + $0x90] ss:$8 sps:$4 sm:$0xff]   ;;  %v1508_v26 = vld [vmem:[%s2086_s3 + $0xa4] ss:$8 sps:$4 sm:$0xff]   ;;  %v1506_v27 = vld [vmem:[%s2086_s3 + $0xa0] ss:$8 sps:$4 sm:$0xff]  }
   0xa   :  { %v1511_v28 = vld [vmem:[%s2086_s3 + $0xb4] ss:$8 sps:$4 sm:$0xff]   ;;  %v1509_v29 = vld [vmem:[%s2086_s3 + $0xb0] ss:$8 sps:$4 sm:$0xff]   ;;  %v1514_v30 = vld [vmem:[%s2086_s3 + $0xc4] ss:$8 sps:$4 sm:$0xff]  }
   0xb   :  { %599 = vmatpush1.bf16.msra.mxu0 %v1479_v9  ;;  %v1512_v31 = vld [vmem:[%s2086_s3 + $0xc0] ss:$8 sps:$4 sm:$0xff]   ;;  %v1517_v32 = vld [vmem:[%s2086_s3 + $0xd4] ss:$8 sps:$4 sm:$0xff]   ;;  %v1515_v33 = vld [vmem:[%s2086_s3 + $0xd0] ss:$8 sps:$4 sm:$0xff]  }
   0xc   :  { %600 = vmatprep.subr.bf16.mxu0 %v1484_v10  ;;  %v1520_v34 = vld [vmem:[%s2086_s3 + $0xe4] ss:$8 sps:$4 sm:$0xff]   ;;  %v1518_v35 = vld [vmem:[%s2086_s3 + $0xe0] ss:$8 sps:$4 sm:$0xff]   ;;  %v1523_v36 = vld [vmem:[%s2086_s3 + $0xf4] ss:$8 sps:$4 sm:$0xff]  }
   0xd   :  { %v1521_v37 = vld [vmem:[%s2086_s3 + $0xf0] ss:$8 sps:$4 sm:$0xff]   ;;  %v1526_v38 = vld [vmem:[%s2086_s3 + $0x104] ss:$8 sps:$4 sm:$0xff]   ;;  %v55_v52 = vsub.s32 0, %v1836_v51  ;;  %v59_v54 = vsub.s32 1, %v1836_v51 }
   0xe   :  { %v1572_v39 = vld [vmem:[%s2087_s5 + $0x40] sm:$0xff]   ;;  %v1574_v41 = vld [vmem:[%s2087_s5 + $0x48] sm:$0xff]   ;;  %v1576_v43 = vld [vmem:[%s2087_s5 + $0x50] sm:$0xff]   ;;  %v63_v55 = vsub.s32 2, %v1836_v51  ;;  %v67_v57 = vsub.s32 3, %v1836_v51 }
   0xf   :  { %601 = vmatpush1.bf16.msra.mxu0 %v1482_v11  ;;  %v1573_v40 = vld [vmem:[%s2087_s5] sm:$0xff]   ;;  %1349 = vmatprep.subr.bf16.mxu1 %v1572_v39  ;;  %v1575_v42 = vld [vmem:[%s2087_s5 + $0x8] sm:$0xff]   ;;  %v1577_v44 = vld [vmem:[%s2087_s5 + $0x10] sm:$0xff]  }
  0x10   :  { %602 = vmatprep.subr.bf16.mxu0 %v1487_v12  ;;  %1350 = vmatpush3.bf16.msra.mxu1 %v1573_v40  ;;  %v1578_v45 = vld [vmem:[%s2087_s5 + $0x58] sm:$0xff]   ;;  %v1580_v47 = vld [vmem:[%s2087_s5 + $0x60] sm:$0xff]   ;;  %v1582_v49 = vld [vmem:[%s2087_s5 + $0x68] sm:$0xff]  }
  0x11   :  { %1351 = vmatprep.subr.bf16.mxu1 %v1574_v41  ;;  %v1579_v46 = vld [vmem:[%s2087_s5 + $0x18] sm:$0xff]   ;;  %v1581_v48 = vld [vmem:[%s2087_s5 + $0x20] sm:$0xff]   ;;  %v1589_v51 = vld [vmem:[%s2089_s7 + $0x8] sm:$0xff]  }
  0x12   :  { %v51_v53 = vld [vmem:[%s2088_s2] sm:$0xf]  ;;  %v1545_v39 = vld [vmem:[%s2086_s3 + $0x170] ss:$8 sps:$4 sm:$0xff]   ;;  %v1550_v40 = vld [vmem:[%s2086_s3 + $0x184] ss:$8 sps:$4 sm:$0xff]  }
  0x13   :  { %603 = vmatpush1.bf16.msra.mxu0 %v1485_v13  ;;  %v56_v56 = vrot.slane %v51_v53, %v55_v52  ;;  %v60_v58 = vrot.slane %v51_v53, %v59_v54  ;;  %v64_v60 = vrot.slane %v51_v53, %v63_v55  ;;  %v68_v63 = vrot.slane %v51_v53, %v67_v57  ;;  %v1548_v41 = vld [vmem:[%s2086_s3 + $0x180] ss:$8 sps:$4 sm:$0xff]   ;;  %v1565_v50 = vld [vmem:[%s2086_s3 + $0x1d4] ss:$8 sps:$4 sm:$0xff]   ;;  %v1563_v53 = vld [vmem:[%s2086_s3 + $0x1d0] ss:$8 sps:$4 sm:$0xff]  }
  0x14   :  { %604 = vmatprep.subr.bf16.mxu0 %v1490_v14  ;;  %1352 = vmatpush3.bf16.msra.mxu1 %v1575_v42  ;;  %v1553_v42 = vld [vmem:[%s2086_s3 + $0x194] ss:$8 sps:$4 sm:$0xff]   ;;  %v1568_v55 = vld [vmem:[%s2086_s3 + $0x1e4] ss:$8 sps:$4 sm:$0xff]  }
  0x15   :  { %1353 = vmatprep.subr.bf16.mxu1 %v1576_v43  ;;  %v1551_v43 = vld [vmem:[%s2086_s3 + $0x190] ss:$8 sps:$4 sm:$0xff]   ;;  %v1571_v57 = vld [vmem:[%s2086_s3 + $0x1f4] ss:$8 sps:$4 sm:$0xff]  }
  0x17   :  { %605 = vmatpush1.bf16.msra.mxu0 %v1488_v15 }
  0x18   :  { %606 = vmatprep.subr.bf16.mxu0 %v1493_v16  ;;  %1354 = vmatpush3.bf16.msra.mxu1 %v1577_v44  ;;  %v1556_v44 = vld [vmem:[%s2086_s3 + $0x1a4] ss:$8 sps:$4 sm:$0xff]  }
  0x19   :  { %1355 = vmatprep.subr.bf16.mxu1 %v1578_v45  ;;  %v1554_v45 = vld [vmem:[%s2086_s3 + $0x1a0] ss:$8 sps:$4 sm:$0xff]  }
  0x1b   :  { %607 = vmatpush1.bf16.msra.mxu0 %v1491_v17 }
  0x1c   :  { %608 = vmatprep.subr.bf16.mxu0 %v1496_v18  ;;  %1356 = vmatpush3.bf16.msra.mxu1 %v1579_v46  ;;  %v1559_v46 = vld [vmem:[%s2086_s3 + $0x1b4] ss:$8 sps:$4 sm:$0xff]  }
  0x1d   :  { %1357 = vmatprep.subr.bf16.mxu1 %v1580_v47  ;;  %v1557_v47 = vld [vmem:[%s2086_s3 + $0x1b0] ss:$8 sps:$4 sm:$0xff]  }
  0x1f   :  { %609 = vmatpush1.bf16.msra.mxu0 %v1494_v19 }
  0x20   :  { %610 = vmatprep.subr.bf16.mxu0 %v1499_v20  ;;  %1358 = vmatpush3.bf16.msra.mxu1 %v1581_v48  ;;  %v1562_v48 = vld [vmem:[%s2086_s3 + $0x1c4] ss:$8 sps:$4 sm:$0xff]  }
  0x21   :  { %1359 = vmatprep.subr.bf16.mxu1 %v1582_v49  ;;  %v1560_v49 = vld [vmem:[%s2086_s3 + $0x1c0] ss:$8 sps:$4 sm:$0xff]  }
  0x23   :  { %611 = vmatpush1.bf16.msra.mxu0 %v1497_v21  ;;  %v1524_v21 = vld [vmem:[%s2086_s3 + $0x100] ss:$8 sps:$4 sm:$0xff]  }
  0x24   :  { %612 = vmatprep.subr.bf16.mxu0 %v1502_v22 }
  0x27   :  { %613 = vmatpush1.bf16.msra.mxu0 %v1500_v23  ;;  %v1529_v23 = vld [vmem:[%s2086_s3 + $0x114] ss:$8 sps:$4 sm:$0xff]  }
  0x28   :  { %614 = vmatprep.subr.bf16.mxu0 %v1505_v24 }
  0x2b   :  { %615 = vmatpush1.bf16.msra.mxu0 %v1503_v25 }
  0x2c   :  { %616 = vmatprep.subr.bf16.mxu0 %v1508_v26 }
  0x2f   :  { %617 = vmatpush1.bf16.msra.mxu0 %v1506_v27  ;;  %v1527_v27 = vld [vmem:[%s2086_s3 + $0x110] ss:$8 sps:$4 sm:$0xff]  }
  0x30   :  { %618 = vmatprep.subr.bf16.mxu0 %v1511_v28  ;;  %v1532_v28 = vld [vmem:[%s2086_s3 + $0x124] ss:$8 sps:$4 sm:$0xff]  }
  0x33   :  { %619 = vmatpush1.bf16.msra.mxu0 %v1509_v29  ;;  %v1530_v29 = vld [vmem:[%s2086_s3 + $0x120] ss:$8 sps:$4 sm:$0xff]  }
  0x34   :  { %620 = vmatprep.subr.bf16.mxu0 %v1514_v30  ;;  %v1535_v30 = vld [vmem:[%s2086_s3 + $0x134] ss:$8 sps:$4 sm:$0xff]  }
  0x37   :  { %621 = vmatpush1.bf16.msra.mxu0 %v1512_v31  ;;  %v1533_v31 = vld [vmem:[%s2086_s3 + $0x130] ss:$8 sps:$4 sm:$0xff]  }
  0x38   :  { %622 = vmatprep.subr.bf16.mxu0 %v1517_v32  ;;  %v1538_v32 = vld [vmem:[%s2086_s3 + $0x144] ss:$8 sps:$4 sm:$0xff]  }
  0x3b   :  { %623 = vmatpush1.bf16.msra.mxu0 %v1515_v33  ;;  %v1536_v33 = vld [vmem:[%s2086_s3 + $0x140] ss:$8 sps:$4 sm:$0xff]  }
  0x3c   :  { %624 = vmatprep.subr.bf16.mxu0 %v1520_v34  ;;  %v1541_v34 = vld [vmem:[%s2086_s3 + $0x154] ss:$8 sps:$4 sm:$0xff]  }
  0x3f   :  { %625 = vmatpush1.bf16.msra.mxu0 %v1518_v35  ;;  %v1539_v35 = vld [vmem:[%s2086_s3 + $0x150] ss:$8 sps:$4 sm:$0xff]  }
  0x40   :  { %626 = vmatprep.subr.bf16.mxu0 %v1523_v36  ;;  %v1544_v36 = vld [vmem:[%s2086_s3 + $0x164] ss:$8 sps:$4 sm:$0xff]  }
  0x43   :  { %627 = vmatpush1.bf16.msra.mxu0 %v1521_v37  ;;  %v1542_v37 = vld [vmem:[%s2086_s3 + $0x160] ss:$8 sps:$4 sm:$0xff]  }
  0x44   :  { %639 = vmatprep.subr.bf16.mxu0 %v1526_v38  ;;  %v1547_v38 = vld [vmem:[%s2086_s3 + $0x174] ss:$8 sps:$4 sm:$0xff]  }
  0xd9   :  { %v136_v59 = vpop.f32.mrb[0].mxu0  ;;  %v179_v4 = vpop.f32.mrb[0].mxu1 }
  0xda   :  { %v137_v61 = vadd.f32 %v136_v59, %v56_v56  ;;  %v138_v62 = vpop.f32.mrb[1].mxu0  ;;  %v180_v6 = vadd.f32 %v179_v4, %v64_v60  ;;  %v181_v7 = vpop.f32.mrb[1].mxu1  ;;  %v1583_v59 = vld [vmem:[%s2087_s5 + $0x28] sm:$0xff]  }
  0xdb   :  { %v139_v0 = vadd.f32 %v138_v62, %v60_v58  ;;  %v140_v1 = vpop.f32.mrb[2].mxu0  ;;  %v182_v10 = vadd.f32 %v181_v7, %v68_v63  ;;  %v183_v11 = vpop.f32.mrb[2].mxu1  ;;  %1360 = vmatpush3.bf16.msra.mxu1 %v1583_v59  ;;  %v1586_v62 = vld [vmem:[%s2087_s5 + $0x78] sm:$0xff]  }
  0xdc   :  { %v141_v2 = vadd.f32 %v140_v1, %v56_v56  ;;  %v142_v3 = vpop.f32.mrb[3].mxu0  ;;  %v188_v8 = vmax.f32 %v137_v61, 0.0  ;;  %v190_v14 = vmax.f32 %v180_v6, 0.0  ;;  %v184_v15 = vadd.f32 %v183_v11, %v64_v60  ;;  %v185_v16 = vpop.f32.mrb[3].mxu1  ;;  %v1566_v56 = vld [vmem:[%s2086_s3 + $0x1e0] ss:$8 sps:$4 sm:$0xff]  }
  0xdd   :  { %v143_v5 = vadd.f32 %v142_v3, %v60_v58  ;;  %v189_v12 = vmax.f32 %v139_v0, 0.0  ;;  %v191_v18 = vmax.f32 %v182_v10, 0.0  ;;  %v186_v19 = vadd.f32 %v185_v16, %v68_v63  ;;  %v1569_v58 = vld [vmem:[%s2086_s3 + $0x1f0] ss:$8 sps:$4 sm:$0xff]   ;;  %v264_v1 = vld [vmem:[%s2090_s4] sm:$0x3] }
  0xde   :  { %v192_v9 = vmax.f32 %v141_v2, 0.0  ;;  %v194_v22 = vmax.f32 %v184_v15, 0.0  ;;  %v1584_v60 = vld [vmem:[%s2087_s5 + $0x70] sm:$0xff]   ;;  %v1587_v63 = vld [vmem:[%s2087_s5 + $0x38] sm:$0xff]   ;;  %v1617_v0 = vmov 0.0   ;;  %v269_v2 = vrot.slane %v264_v1, %v55_v52  ;;  %v1588_v52 = vld [vmem:[%s2089_s7] sm:$0xff]  }
  0xdf   :  { %v193_v13 = vmax.f32 %v143_v5, 0.0  ;;  %v195_v24 = vmax.f32 %v186_v19, 0.0  ;;  %v1585_v61 = vld [vmem:[%s2087_s5 + $0x30] sm:$0xff]   ;;  %1361 = vmatprep.subr.bf16.mxu1 %v1584_v60  ;;  %v273_v3 = vrot.slane %v264_v1, %v59_v54  ;;  %v1592_v19 = vld [vmem:[%s2089_s7 + $0x20] sm:$0xff]   ;;  %v1607_v59 = vld [vmem:[%s2093_s11 + $0x18] sm:$0xff]  }
  0xe0   :  { %v196_v17 = vpack.c.bf16 %v192_v9, %v188_v8  ;;  %v1855_v25 = vpack.c.bf16 %v194_v22, %v190_v14  ;;  %1362 = vmatpush3.bf16.msra.mxu1 %v1585_v61  ;;  %v1590_v54 = vld [vmem:[%s2089_s7 + $0x10] sm:$0xff]   ;;  %v1595_v22 = vld [vmem:[%s2089_s7 + $0x38] sm:$0xff]   ;;  %v1608_v60 = vld [vmem:[%s2093_s11 + $0x20] sm:$0xff]  }
  0xe1   :  { %v197_v20 = vpack.c.bf16 %v193_v13, %v189_v12  ;;  %v199_v26 = vpack.c.bf16 %v195_v24, %v191_v18  ;;  %1363 = vmatprep.subr.bf16.mxu1 %v1586_v62  ;;  %v1591_v18 = vld [vmem:[%s2089_s7 + $0x18] sm:$0xff]   ;;  %v1296_v24 = vld [vmem:[%s2092_s6] ss:$0 sm:$0xff]  ;;  %v1609_v61 = vld [vmem:[%s2093_s11 + $0x28] sm:$0xff]  }
  0xe2   :  { %v1610_v62 = vld [vmem:[%s2093_s11 + $0x30] sm:$0xff]   ;;  %v1322_v1 = vld [vmem:[%s2095_s10] ss:$0 sm:$0xff] }
  0xe3   :  { %628 = vmatprep.mubr.bf16.mxu0 %v197_v20  ;;  %v1593_v20 = vld [vmem:[%s2089_s7 + $0x28] sm:$0xff]  }
  0xe4   :  { %629 = vmatmul.mubr.bf16.vlgmr.msra.gmra.mrb[4].mxu0 %v196_v17  ;;  %1364 = vmatpush3.bf16.msra.mxu1 %v1587_v63  ;;  %v1611_v63 = vld [vmem:[%s2093_s11 + $0x38] sm:$0xff]  }
  0xe5   :  { %640 = vmatpush1.bf16.msra.mxu0 %v1524_v21  ;;  %671 = vmatprep.mubr.bf16.mxu0 %v199_v26  ;;  %v1594_v21 = vld [vmem:[%s2089_s7 + $0x30] sm:$0xff]  }
  0xe6   :  { %641 = vmatprep.subr.bf16.mxu0 %v1529_v23  ;;  %1398 = vmatprep.subr.bf16.mxu1 %v1617_v0 }
  0xe9   :  { %642 = vmatpush1.bf16.msra.mxu0 %v1527_v27 }
  0xea   :  { %643 = vmatprep.subr.bf16.mxu0 %v1532_v28 }
  0xed   :  { %644 = vmatpush1.bf16.msra.mxu0 %v1530_v29 }
  0xee   :  { %645 = vmatprep.subr.bf16.mxu0 %v1535_v30 }
  0xf1   :  { %646 = vmatpush1.bf16.msra.mxu0 %v1533_v31 }
  0xf2   :  { %647 = vmatprep.subr.bf16.mxu0 %v1538_v32 }
  0xf5   :  { %648 = vmatpush1.bf16.msra.mxu0 %v1536_v33 }
  0xf6   :  { %649 = vmatprep.subr.bf16.mxu0 %v1541_v34  ;;  %v1596_v34 = vld [vmem:[%s2091_s9] sm:$0xff]  }
  0xf9   :  { %650 = vmatpush1.bf16.msra.mxu0 %v1539_v35 }
  0xfa   :  { %651 = vmatprep.subr.bf16.mxu0 %v1544_v36  ;;  %v1597_v36 = vld [vmem:[%s2091_s9 + $0x8] sm:$0xff]  }
  0xfd   :  { %652 = vmatpush1.bf16.msra.mxu0 %v1542_v37  ;;  %v1598_v37 = vld [vmem:[%s2091_s9 + $0x10] sm:$0xff]  }
  0xfe   :  { %653 = vmatprep.subr.bf16.mxu0 %v1547_v38  ;;  %v1599_v38 = vld [vmem:[%s2091_s9 + $0x18] sm:$0xff]  }
 0x101   :  { %654 = vmatpush1.bf16.msra.mxu0 %v1545_v39  ;;  %v1600_v39 = vld [vmem:[%s2091_s9 + $0x20] sm:$0xff]  }
 0x102   :  { %655 = vmatprep.subr.bf16.mxu0 %v1550_v40  ;;  %v1601_v40 = vld [vmem:[%s2091_s9 + $0x28] sm:$0xff]  }
 0x105   :  { %656 = vmatpush1.bf16.msra.mxu0 %v1548_v41  ;;  %v1602_v41 = vld [vmem:[%s2091_s9 + $0x30] sm:$0xff]  }
 0x106   :  { %657 = vmatprep.subr.bf16.mxu0 %v1553_v42  ;;  %v1603_v42 = vld [vmem:[%s2091_s9 + $0x38] sm:$0xff]  }
 0x109   :  { %658 = vmatpush1.bf16.msra.mxu0 %v1551_v43  ;;  %v1313_v43 = vld [vmem:[%s2094_s8] ss:$0 sm:$0xff] }
 0x10a   :  { %659 = vmatprep.subr.bf16.mxu0 %v1556_v44 }
 0x10d   :  { %660 = vmatpush1.bf16.msra.mxu0 %v1554_v45 }
 0x10e   :  { %661 = vmatprep.subr.bf16.mxu0 %v1559_v46 }
 0x111   :  { %662 = vmatpush1.bf16.msra.mxu0 %v1557_v47 }
 0x112   :  { %663 = vmatprep.subr.bf16.mxu0 %v1562_v48 }
 0x115   :  { %664 = vmatpush1.bf16.msra.mxu0 %v1560_v49 }
 0x116   :  { %665 = vmatprep.subr.bf16.mxu0 %v1565_v50 }
 0x119   :  { %666 = vmatpush1.bf16.msra.mxu0 %v1563_v53 }
 0x11a   :  { %667 = vmatprep.subr.bf16.mxu0 %v1568_v55  ;;  %v1604_v55 = vld [vmem:[%s2093_s11] sm:$0xff]  }
 0x11d   :  { %668 = vmatpush1.bf16.msra.mxu0 %v1566_v56 }
 0x11e   :  { %669 = vmatprep.subr.bf16.mxu0 %v1571_v57  ;;  %v1605_v57 = vld [vmem:[%s2093_s11 + $0x8] sm:$0xff]  }
 0x121   :  { %670 = vmatpush1.bf16.msra.mxu0 %v1569_v58  ;;  %v1606_v58 = vld [vmem:[%s2093_s11 + $0x10] sm:$0xff]  }
 0x124   :  { %672 = vmatmul.mubr.bf16.vlgmr.msra.gmra.mrb[4].mxu0 %v1855_v25 }
 0x1f7   :  { %v673_v4 = vpop.f32.mrb[4].mxu0 }
 0x1f8   :  { %v1458_v5 = vadd.f32 %v673_v4, %v269_v2  ;;  %v675_v6 = vpop.f32.mrb[5].mxu0 }
 0x1f9   :  { %v1459_v7 = vadd.f32 %v675_v6, %v273_v3  ;;  %v677_v8 = vpop.f32.mrb[6].mxu0 }
 0x1fa   :  { %v1460_v9 = vadd.f32 %v677_v8, %v269_v2  ;;  %v679_v10 = vpop.f32.mrb[7].mxu0  ;;  %v682_v12 = vmax.f32 %v1458_v5, 0.0 }
 0x1fb   :  { %v1461_v11 = vadd.f32 %v679_v10, %v273_v3  ;;  %v683_v14 = vmax.f32 %v1459_v7, 0.0 }
 0x1fc   :  { %v684_v13 = vmax.f32 %v1460_v9, 0.0 }
 0x1fd   :  { %v685_v15 = vmax.f32 %v1461_v11, 0.0 }
 0x1fe   :  { %v686_v16 = vpack.c.bf16 %v684_v13, %v682_v12 }
 0x1ff   :  { %v687_v17 = vpack.c.bf16 %v685_v15, %v683_v14 }
 0x201   :  { %855 = vmatprep.mubr.bf16.mxu1 %v687_v17 }
 0x202   :  { %856 = vmatmul.mubr.bf16.vlgmr.msra.gmra.mrb[4].mxu1 %v686_v16 }
 0x203   :  { %1399 = vmatpush3.bf16.msra.mxu1 %v1588_v52  ;;  %1414 = vmatprep.mubr.msk.bf16.mxu1 %vm1618_vm1, %v1617_v0 }
 0x204   :  { %1400 = vmatprep.subr.bf16.mxu1 %v1617_v0 }
 0x207   :  { %1401 = vmatpush3.bf16.msra.mxu1 %v1589_v51 }
 0x208   :  { %1402 = vmatprep.subr.bf16.mxu1 %v1617_v0 }
 0x20b   :  { %1403 = vmatpush3.bf16.msra.mxu1 %v1590_v54 }
 0x20c   :  { %1404 = vmatprep.subr.bf16.mxu1 %v1617_v0 }
 0x20f   :  { %1405 = vmatpush3.bf16.msra.mxu1 %v1591_v18 }
 0x210   :  { %1406 = vmatprep.subr.bf16.mxu1 %v1617_v0 }
 0x213   :  { %1407 = vmatpush3.bf16.msra.mxu1 %v1592_v19 }
 0x214   :  { %1408 = vmatprep.subr.bf16.mxu1 %v1617_v0 }
 0x217   :  { %1409 = vmatpush3.bf16.msra.mxu1 %v1593_v20 }
 0x218   :  { %1410 = vmatprep.subr.bf16.mxu1 %v1617_v0 }
 0x21b   :  { %1411 = vmatpush3.bf16.msra.mxu1 %v1594_v21 }
 0x21c   :  { %1412 = vmatprep.subr.bf16.mxu1 %v1617_v0 }
 0x21f   :  { %1413 = vmatpush3.bf16.msra.mxu1 %v1595_v22 }
 0x220   :  { %1418 = vmatprep.subr.bf16.mxu1 %v1617_v0 }
 0x2d5   :  { %v1365_v23 = vpop.f32.mrb[4].mxu1 }
 0x2d6   :  { %v1366_v25 = vpop.f32.mrb[5].mxu1 }
 0x2d7   :  { %v1367_v26 = vadd.f32 %v1366_v25, %v1365_v23  ;;  %v1368_v27 = vpop.f32.mrb[6].mxu1 }
 0x2d8   :  { %v1369_v28 = vpop.f32.mrb[7].mxu1 }
 0x2d9   :  { %v858_v29 = vadd.f32 %v1367_v26, %v1296_v24  ;;  %v1370_v30 = vadd.f32 %v1369_v28, %v1368_v27 }
 0x2db   :  { %v861_v31 = vadd.f32 %v1370_v30, %v1296_v24  ;;  %v864_v32 = vmax.f32 %v858_v29, 0.0 }
 0x2dd   :  { %v865_v33 = vmax.f32 %v861_v31, 0.0 }
 0x2df   :  { %v866_v35 = vpack.c.bf16 %v865_v33, %v864_v32 }
 0x2e1   :  { %1415 = vmatmul.mubr.bf16.vlgmr.msra.gmra.mrb[8].mxu1 %v866_v35 }
 0x2e2   :  { %1419 = vmatpush3.bf16.msra.mxu1 %v1596_v34  ;;  %1434 = vmatprep.mubr.msk.bf16.mxu1 %vm1618_vm1, %v1617_v0 }
 0x2e3   :  { %1420 = vmatprep.subr.bf16.mxu1 %v1617_v0 }
 0x2e6   :  { %1421 = vmatpush3.bf16.msra.mxu1 %v1597_v36 }
 0x2e7   :  { %1422 = vmatprep.subr.bf16.mxu1 %v1617_v0 }
 0x2ea   :  { %1423 = vmatpush3.bf16.msra.mxu1 %v1598_v37 }
 0x2eb   :  { %1424 = vmatprep.subr.bf16.mxu1 %v1617_v0 }
 0x2ee   :  { %1425 = vmatpush3.bf16.msra.mxu1 %v1599_v38 }
 0x2ef   :  { %1426 = vmatprep.subr.bf16.mxu1 %v1617_v0 }
 0x2f2   :  { %1427 = vmatpush3.bf16.msra.mxu1 %v1600_v39 }
 0x2f3   :  { %1428 = vmatprep.subr.bf16.mxu1 %v1617_v0 }
 0x2f6   :  { %1429 = vmatpush3.bf16.msra.mxu1 %v1601_v40 }
 0x2f7   :  { %1430 = vmatprep.subr.bf16.mxu1 %v1617_v0 }
 0x2fa   :  { %1431 = vmatpush3.bf16.msra.mxu1 %v1602_v41 }
 0x2fb   :  { %1432 = vmatprep.subr.bf16.mxu1 %v1617_v0 }
 0x2fe   :  { %1433 = vmatpush3.bf16.msra.mxu1 %v1603_v42 }
 0x2ff   :  { %1438 = vmatprep.subr.bf16.mxu1 %v1617_v0 }
 0x3b4   :  { %v972_v44 = vpop.f32.mrb[8].mxu1 }
 0x3b5   :  { %v973_v45 = vadd.f32 %v1313_v43, %v972_v44  ;;  %v1416_v46 = vpop.f32.mrb[9].mxu1 }
 0x3b6   :  { %v975_v47 = vpop.f32.mrb[10].mxu1 }
 0x3b7   :  { %v976_v48 = vadd.f32 %v1313_v43, %v975_v47  ;;  %v1417_v49 = vpop.f32.mrb[11].mxu1  ;;  %v979_v50 = vmax.f32 %v973_v45, 0.0 }
 0x3b9   :  { %v980_v53 = vmax.f32 %v976_v48, 0.0 }
 0x3bb   :  { %v981_v56 = vpack.c.bf16 %v980_v53, %v979_v50 }
 0x3bd   :  { %1435 = vmatmul.mubr.bf16.vlgmr.msra.gmra.mrb[12].mxu1 %v981_v56 }
 0x3be   :  { %1439 = vmatpush3.bf16.msra.mxu1 %v1604_v55  ;;  %1454 = vmatprep.mubr.msk.bf16.mxu1 %vm1618_vm1, %v1617_v0 }
 0x3bf   :  { %1440 = vmatprep.subr.bf16.mxu1 %v1617_v0 }
 0x3c2   :  { %1441 = vmatpush3.bf16.msra.mxu1 %v1605_v57 }
 0x3c3   :  { %1442 = vmatprep.subr.bf16.mxu1 %v1617_v0 }
 0x3c6   :  { %1443 = vmatpush3.bf16.msra.mxu1 %v1606_v58 }
 0x3c7   :  { %1444 = vmatprep.subr.bf16.mxu1 %v1617_v0 }
 0x3ca   :  { %1445 = vmatpush3.bf16.msra.mxu1 %v1607_v59 }
 0x3cb   :  { %1446 = vmatprep.subr.bf16.mxu1 %v1617_v0 }
 0x3ce   :  { %1447 = vmatpush3.bf16.msra.mxu1 %v1608_v60 }
 0x3cf   :  { %1448 = vmatprep.subr.bf16.mxu1 %v1617_v0 }
 0x3d2   :  { %1449 = vmatpush3.bf16.msra.mxu1 %v1609_v61 }
 0x3d3   :  { %1450 = vmatprep.subr.bf16.mxu1 %v1617_v0 }
 0x3d6   :  { %1451 = vmatpush3.bf16.msra.mxu1 %v1610_v62 }
 0x3d7   :  { %1452 = vmatprep.subr.bf16.mxu1 %v1617_v0  ;;  %v1331_v0 = vld [vmem:[%s2096_s12] ss:$0 sm:$0xff] }
 0x3da   :  { %1453 = vmatpush3.bf16.msra.mxu1 %v1611_v63 }
 0x490   :  { %v1087_v2 = vpop.f32.mrb[12].mxu1 }
 0x491   :  { %v1088_v3 = vadd.f32 %v1322_v1, %v1087_v2  ;;  %v1436_v4 = vpop.f32.mrb[13].mxu1 }
 0x492   :  { %v1090_v5 = vpop.f32.mrb[14].mxu1 }
 0x493   :  { %v1091_v6 = vadd.f32 %v1322_v1, %v1090_v5  ;;  %v1437_v7 = vpop.f32.mrb[15].mxu1  ;;  %v1094_v8 = vmax.f32 %v1088_v3, 0.0 }
 0x495   :  { %v1095_v9 = vmax.f32 %v1091_v6, 0.0 }
 0x497   :  { %v1096_v10 = vpack.c.bf16 %v1095_v9, %v1094_v8 }
 0x499   :  { %1455 = vmatmul.mubr.bf16.vlgmr.msra.gmra.mrb[16].mxu1 %v1096_v10 }
 0x56c   :  { %v1202_v11 = vpop.f32.mrb[16].mxu1 }
 0x56d   :  { %v1203_v12 = vadd.f32 %v1331_v0, %v1202_v11  ;;  %v1456_v13 = vpop.f32.mrb[17].mxu1 }
 0x56e   :  { %v1205_v14 = vpop.f32.mrb[18].mxu1 }
 0x56f   :  { %v1206_v15 = vadd.f32 %v1331_v0, %v1205_v14  ;;  %v1457_v16 = vpop.f32.mrb[19].mxu1  ;;  %1612 = vtanh.f32 %v1203_v12 }
 0x571   :  { %1614 = vtanh.f32 %v1206_v15 }
 0x579   :  { %v1613_v17 = vpop.eup %1612 }
 0x57b   :  { %v1615_v52 = vpop.eup %1614 }
 0x57c   :  { %v1347_v51 = vpack.c.bf16 %v1615_v52, %v1613_v17 }
 0x57e   :  { %1348 = vst [vmem:[%s2097_s13] sm:$0xff] %v1347_v51  }

</bundles_post_ra>
